<compile_context>
chip_gen: v5e
topology: v5e:2x2
jax: 0.10.0
libtpu: 0.0.40
codegen_flags: <defaults>
</compile_context>

<pallas_src>
import jax
import jax.numpy as jnp
from jax.experimental import pallas as pl
from jax.experimental.pallas import tpu as pltpu

_LANE = 128  # TPU lane width; batch tiles must be a multiple of this.


def _mlp_kernel(x_ref, w1_ref, b1_ref, w2_ref, b2_ref, w3_ref, b3_ref, o_ref):
    # x_ref: (10, TB)  -- features on sublanes, batch on lanes (lane-dense).
    # w*_ref: PyTorch-native (out, in) layout, so the kernel computes W @ x + b.
    # b*_ref: (out, 1) columns -> broadcast along the lane/batch axis.
    x = x_ref[...]

    h1 = jnp.dot(w1_ref[...], x, preferred_element_type=jnp.float32) + b1_ref[...]
    h1 = jnp.maximum(h1, 0.0)                                   # (50, TB)

    h2 = jnp.dot(w2_ref[...], h1, preferred_element_type=jnp.float32) + b2_ref[...]
    h2 = jnp.maximum(h2, 0.0)                                   # (20, TB)

    out = jnp.dot(w3_ref[...], h2, preferred_element_type=jnp.float32) + b3_ref[...]
    o_ref[...] = out.astype(o_ref.dtype)                        # (1, TB)


def simple_net_forward(x, params, *, tile_batch=1024):
    """x: (B, 10) f32 (PyTorch layout).

    params: w1 (50,10), b1 (50,1), w2 (20,50), b2 (20,1), w3 (1,20), b3 (1,1)
    (weights in PyTorch (out, in) layout). Returns (B, 1) f32.
    """
    B, in_dim = x.shape
    w1, b1 = params["w1"], params["b1"]
    w2, b2 = params["w2"], params["b2"]
    w3, b3 = params["w3"], params["b3"]

    # Batch lives on the lane axis -> tiles must be multiples of 128.
    tb = max(_LANE, (tile_batch // _LANE) * _LANE)
    b_pad = pl.cdiv(B, _LANE) * _LANE
    tb = min(tb, b_pad)
    b_pad = pl.cdiv(b_pad, tb) * tb
    grid = (b_pad // tb,)

    # Transposed, lane-dense activation layout: (features, batch), zero-padded
    # along batch (padded columns are sliced off below; relu/affine on zeros is
    # finite so no numerical hazard).
    xt = jnp.zeros((in_dim, b_pad), x.dtype).at[:, :B].set(x.T)

    # Weights/biases: constant index_map -> DMA'd once, resident across tiles.
    resident = lambda shape: pl.BlockSpec(shape, lambda i: (0, 0))

    flops = 2 * b_pad * (10 * 50 + 50 * 20 + 20 * 1)
    weight_bytes = 4 * (w1.size + b1.size + w2.size + b2.size + w3.size + b3.size)
    bytes_accessed = 4 * b_pad * (in_dim + 1) + weight_bytes

    out_t = pl.pallas_call(
        _mlp_kernel,
        out_shape=jax.ShapeDtypeStruct((1, b_pad), jnp.float32),
        grid=grid,
        in_specs=[
            pl.BlockSpec((in_dim, tb), lambda i: (0, i)),  # x tile, batch on lanes
            resident(w1.shape), resident(b1.shape),
            resident(w2.shape), resident(b2.shape),
            resident(w3.shape), resident(b3.shape),
        ],
        out_specs=pl.BlockSpec((1, tb), lambda i: (0, i)),
        compiler_params=pltpu.CompilerParams(
            dimension_semantics=("parallel",),   # shard batch tiles across TCs (v7x)
        ),
        cost_estimate=pl.CostEstimate(
            flops=flops, transcendentals=0, bytes_accessed=bytes_accessed),
    )(xt, w1, b1, w2, b2, w3, b3)

    return out_t[:, :B].T  # back to PyTorch-style (B, 1)


def init_params(key):
    """Deterministic init matching nn.Linear defaults.

    Weights stored in PyTorch (out, in) layout; biases as (out, 1) columns so
    they broadcast along the lane/batch axis inside the kernel.
    """
    dims = [(10, 50), (50, 20), (20, 1)]
    params = {}
    keys = jax.random.split(key, 2 * len(dims))
    for i, (fan_in, fan_out) in enumerate(dims):
        bound = 1.0 / (fan_in ** 0.5)
        w = jax.random.uniform(keys[2 * i], (fan_out, fan_in),
                               minval=-bound, maxval=bound, dtype=jnp.float32)
        b = jax.random.uniform(keys[2 * i + 1], (fan_out, 1),
                               minval=-bound, maxval=bound, dtype=jnp.float32)
        params[f"w{i + 1}"] = w
        params[f"b{i + 1}"] = b
    return params


def _reference_forward(x, params):
    h1 = jnp.maximum(x @ params["w1"].T + params["b1"].T, 0.0)
    h2 = jnp.maximum(h1 @ params["w2"].T + params["b2"].T, 0.0)
    return h2 @ params["w3"].T + params["b3"].T


if __name__ == "__main__":
    key = jax.random.PRNGKey(0)
    pkey, xkey1, xkey2 = jax.random.split(key, 3)
    params = init_params(pkey)

    # Small demo batch (pads up to one 128-wide lane tile, grid = (1,)).
    batch = 8
    x = jax.random.normal(xkey1, (batch, 10), dtype=jnp.float32)
    out = jax.block_until_ready(simple_net_forward(x, params))
    ref = _reference_forward(x, params)
    assert out.shape == (batch, 1)
    assert jnp.allclose(out, ref, atol=1e-4, rtol=1e-4)

    # Non-multiple-of-128 batch with grid > 1 to exercise the tiled/pipelined path.
    batch2 = 300
    x2 = jax.random.normal(xkey2, (batch2, 10), dtype=jnp.float32)
    out2 = jax.block_until_ready(simple_net_forward(x2, params, tile_batch=128))
    ref2 = _reference_forward(x2, params)
    assert out2.shape == (batch2, 1)
    assert jnp.allclose(out2, ref2, atol=1e-4, rtol=1e-4)

    print("KERNEL_OK")
</pallas_src>

<mosaic_0001>
module attributes {stable_mosaic.version = 11 : i64} {
  func.func @_mlp_kernel(%arg0: i32, %arg1: memref<10x128xf32, #tpu.memory_space<vmem>>, %arg2: memref<50x10xf32, #tpu.memory_space<vmem>>, %arg3: memref<50x1xf32, #tpu.memory_space<vmem>>, %arg4: memref<20x50xf32, #tpu.memory_space<vmem>>, %arg5: memref<20x1xf32, #tpu.memory_space<vmem>>, %arg6: memref<1x20xf32, #tpu.memory_space<vmem>>, %arg7: memref<1x1xf32, #tpu.memory_space<vmem>>, %arg8: memref<1x128xf32, #tpu.memory_space<vmem>>) attributes {dimension_semantics = [#tpu.dimension_semantics<parallel>], iteration_bounds = array<i64: 1>, scalar_prefetch = 0 : i64, scratch_operands = 0 : i64, tpu.core_type = #tpu.core_type<tc>, window_params = [{transform_indices = @transform_0, window_bounds = array<i64: 10, 128>}, {pipeline_mode = #tpu.pipeline_mode<synchronous>, transform_indices = @transform_1, window_bounds = array<i64: 50, 10>}, {pipeline_mode = #tpu.pipeline_mode<synchronous>, transform_indices = @transform_2, window_bounds = array<i64: 50, 1>}, {pipeline_mode = #tpu.pipeline_mode<synchronous>, transform_indices = @transform_3, window_bounds = array<i64: 20, 50>}, {pipeline_mode = #tpu.pipeline_mode<synchronous>, transform_indices = @transform_4, window_bounds = array<i64: 20, 1>}, {pipeline_mode = #tpu.pipeline_mode<synchronous>, transform_indices = @transform_5, window_bounds = array<i64: 1, 20>}, {pipeline_mode = #tpu.pipeline_mode<synchronous>, transform_indices = @transform_6, window_bounds = array<i64: 1, 1>}, {transform_indices = @transform_7, window_bounds = array<i64: 1, 128>}]} {
    %c0 = arith.constant 0 : index
    %c0_0 = arith.constant 0 : index
    %0 = vector.load %arg1[%c0, %c0_0] : memref<10x128xf32, #tpu.memory_space<vmem>>, vector<10x128xf32>
    %c0_1 = arith.constant 0 : index
    %c0_2 = arith.constant 0 : index
    %1 = vector.load %arg2[%c0_1, %c0_2] : memref<50x10xf32, #tpu.memory_space<vmem>>, vector<50x10xf32>
    %cst = arith.constant dense<0.000000e+00> : vector<50x128xf32>
    %2 = tpu.matmul %1, %0, %cst {dimension_numbers = #tpu.dot_dimension_numbers<[1], [0], [0], [1], [0, 0, 1, 1], [], []>} : vector<50x10xf32>, vector<10x128xf32>, vector<50x128xf32> -> vector<50x128xf32>
    %c0_3 = arith.constant 0 : index
    %c0_4 = arith.constant 0 : index
    %3 = vector.load %arg3[%c0_3, %c0_4] : memref<50x1xf32, #tpu.memory_space<vmem>>, vector<50x1xf32>
    %4 = vector.broadcast %3 : vector<50x1xf32> to vector<50x128xf32>
    %5 = arith.addf %2, %4 : vector<50x128xf32>
    %cst_5 = arith.constant 0.000000e+00 : f32
    %6 = vector.broadcast %cst_5 : f32 to vector<50x128xf32>
    %7 = arith.maximumf %5, %6 : vector<50x128xf32>
    %c0_6 = arith.constant 0 : index
    %c0_7 = arith.constant 0 : index
    %8 = vector.load %arg4[%c0_6, %c0_7] : memref<20x50xf32, #tpu.memory_space<vmem>>, vector<20x50xf32>
    %cst_8 = arith.constant dense<0.000000e+00> : vector<20x128xf32>
    %9 = tpu.matmul %8, %7, %cst_8 {dimension_numbers = #tpu.dot_dimension_numbers<[1], [0], [0], [1], [0, 0, 1, 1], [], []>} : vector<20x50xf32>, vector<50x128xf32>, vector<20x128xf32> -> vector<20x128xf32>
    %c0_9 = arith.constant 0 : index
    %c0_10 = arith.constant 0 : index
    %10 = vector.load %arg5[%c0_9, %c0_10] : memref<20x1xf32, #tpu.memory_space<vmem>>, vector<20x1xf32>
    %11 = vector.broadcast %10 : vector<20x1xf32> to vector<20x128xf32>
    %12 = arith.addf %9, %11 : vector<20x128xf32>
    %cst_11 = arith.constant 0.000000e+00 : f32
    %13 = vector.broadcast %cst_11 : f32 to vector<20x128xf32>
    %14 = arith.maximumf %12, %13 : vector<20x128xf32>
    %c0_12 = arith.constant 0 : index
    %c0_13 = arith.constant 0 : index
    %15 = vector.load %arg6[%c0_12, %c0_13] : memref<1x20xf32, #tpu.memory_space<vmem>>, vector<1x20xf32>
    %cst_14 = arith.constant dense<0.000000e+00> : vector<1x128xf32>
    %16 = tpu.matmul %15, %14, %cst_14 {dimension_numbers = #tpu.dot_dimension_numbers<[1], [0], [0], [1], [0, 0, 1, 1], [], []>} : vector<1x20xf32>, vector<20x128xf32>, vector<1x128xf32> -> vector<1x128xf32>
    %c0_15 = arith.constant 0 : index
    %c0_16 = arith.constant 0 : index
    %17 = vector.load %arg7[%c0_15, %c0_16] : memref<1x1xf32, #tpu.memory_space<vmem>>, vector<1x1xf32>
    %18 = vector.broadcast %17 : vector<1x1xf32> to vector<1x128xf32>
    %19 = arith.addf %16, %18 : vector<1x128xf32>
    %c0_17 = arith.constant 0 : index
    %c0_18 = arith.constant 0 : index
    %20 = vector.load %arg8[%c0_17, %c0_18] : memref<1x128xf32, #tpu.memory_space<vmem>>, vector<1x128xf32>
    tpu.vector_store %arg8[%c0_17, %c0_18], %19 {strides = array<i32>} : memref<1x128xf32, #tpu.memory_space<vmem>>, vector<1x128xf32>,
    return
  }
  func.func @transform_0(%arg0: i32) -> (i32, i32) {
    %c0_i32 = arith.constant 0 : i32
    %c0_i32_0 = arith.constant 0 : i32
    return %c0_i32, %arg0 : i32, i32
  }
  func.func @transform_1(%arg0: i32) -> (i32, i32) {
    %c0_i32 = arith.constant 0 : i32
    %c0_i32_0 = arith.constant 0 : i32
    %c0_i32_1 = arith.constant 0 : i32
    return %c0_i32, %c0_i32_0 : i32, i32
  }
  func.func @transform_2(%arg0: i32) -> (i32, i32) {
    %c0_i32 = arith.constant 0 : i32
    %c0_i32_0 = arith.constant 0 : i32
    %c0_i32_1 = arith.constant 0 : i32
    return %c0_i32, %c0_i32_0 : i32, i32
  }
  func.func @transform_3(%arg0: i32) -> (i32, i32) {
    %c0_i32 = arith.constant 0 : i32
    %c0_i32_0 = arith.constant 0 : i32
    %c0_i32_1 = arith.constant 0 : i32
    return %c0_i32, %c0_i32_0 : i32, i32
  }
  func.func @transform_4(%arg0: i32) -> (i32, i32) {
    %c0_i32 = arith.constant 0 : i32
    %c0_i32_0 = arith.constant 0 : i32
    %c0_i32_1 = arith.constant 0 : i32
    return %c0_i32, %c0_i32_0 : i32, i32
  }
  func.func @transform_5(%arg0: i32) -> (i32, i32) {
    %c0_i32 = arith.constant 0 : i32
    %c0_i32_0 = arith.constant 0 : i32
    %c0_i32_1 = arith.constant 0 : i32
    return %c0_i32, %c0_i32_0 : i32, i32
  }
  func.func @transform_6(%arg0: i32) -> (i32, i32) {
    %c0_i32 = arith.constant 0 : i32
    %c0_i32_0 = arith.constant 0 : i32
    %c0_i32_1 = arith.constant 0 : i32
    return %c0_i32, %c0_i32_0 : i32, i32
  }
  func.func @transform_7(%arg0: i32) -> (i32, i32) {
    %c0_i32 = arith.constant 0 : i32
    %c0_i32_0 = arith.constant 0 : i32
    return %c0_i32, %arg0 : i32, i32
  }
}

</mosaic_0001>

<bundles_post_ra>
// kernel: tpu_custom_call.1
= control target key start
LH: loop header
LB: loop body
LE: loop exit
PB: predicated region body
PF: predicated region fallthrough
CT: control target
= control target key end

     0   :  { %s441_s0 = inlined_call_operand.vmem [shape: f32[10,128], index: 0, kind: input, shape index: {}]   ;;  %s442_s1 = inlined_call_operand.vmem [shape: f32[50,10], index: 1, kind: input, shape index: {}]   ;;  %s443_s2 = inlined_call_operand.vmem [shape: f32[50,1], index: 2, kind: input, shape index: {}]   ;;  %s444_s3 = inlined_call_operand.vmem [shape: f32[20,50], index: 3, kind: input, shape index: {}]   ;;  %s445_s4 = inlined_call_operand.vmem [shape: f32[20,1], index: 4, kind: input, shape index: {}]   ;;  %s446_s5 = inlined_call_operand.vmem [shape: f32[1,20], index: 5, kind: input, shape index: {}]   ;;  %s447_s6 = inlined_call_operand.<no memory space> [shape: f32[1,1], index: 6, kind: input, shape index: {}]   ;;  %s448_s7 = inlined_call_operand.hbm [shape: f32[1,128], index: 7, kind: output, shape index: {}]  }
   0x1   :  { %v12_v0 = vstv %s447_s6 }
   0x2   :  { %13 = vst [vmem:[#allocation2] sm:$0x1] %v12_v0 }
   0x3   :  { %v30_v1 = vld [vmem:[%s441_s0 + $0x8] sm:$0x3]  ;;  %vm102_vm0 = vcmask 1041408   ;;  %v44_v2 = vld [vmem:[%s443_s2 + $0x30] sm:$0x3]  ;;  %v29_v3 = vld [vmem:[%s441_s0] sm:$0xff] }
   0x4   :  { %267 = vmatpush.msk.msra.mxu0 %vm102_vm0, %v30_v1  ;;  %281 = vmatpush.msk.msra.mxu3 %vm102_vm0, %v30_v1  ;;  %v31_v4 = vld [vmem:[%s442_s1] sm:$0xff]  ;;  %vm80_vm1 = vcmask 80896   ;;  %v314_v5 = vmov 0   ;;  %v40_v8 = vld [vmem:[%s443_s2 + $0x10] sm:$0xff] }
   0x5   :  { %285 = vset.pattern.permute.xlu0 %v314_v5  ;;  %v35_v6 = vld [vmem:[%s442_s1 + $0x20] sm:$0xff]  ;;  %286 = vset.pattern.permute.xlu1 %v314_v5 }
   0x6   :  { %v42_v7 = vld [vmem:[%s443_s2 + $0x20] sm:$0xff]  ;;  %77 = vperm.xlu0 %285, %v44_v2   ;;  %121 = vmatpush.msra.mxu0 %v29_v3 }
   0x7   :  { %282 = vmatpush.msra.mxu3 %v29_v3  ;;  %268 = vmatmul.msk.f32.vlgmr.msra.gmra.mxu0 %vm80_vm1, %v31_v4 }
   0x8   :  { %272 = vmatmul.msk.f32.vlgmr.msra.gmra.mxu3 %vm80_vm1, %v35_v6  ;;  %67 = vperm.xlu1 %286, %v42_v7  }
   0x9   :  { %287 = vset.pattern.permute.xlu2 %v314_v5 }
   0xa   :  { %57 = vperm.xlu2 %287, %v40_v8  }
   0xb   :  { %14 = vsyncpa [#allocation4], 0  ;;  %v43_v9 = vld [vmem:[%s443_s2 + $0x28] sm:$0xff]  ;;  %v41_v12 = vld [vmem:[%s443_s2 + $0x18] sm:$0xff]  ;;  %vm172_vm2 = vcmask 408576   ;;  %vm226_vm3 = vcmask 1043456  }
   0xc   :  { %v32_v10 = vld [vmem:[%s442_s1 + $0x8] sm:$0xff]  ;;  %v38_v14 = vld [vmem:[%s443_s2] sm:$0xff]  ;;  %v33_v15 = vld [vmem:[%s442_s1 + $0x10] sm:$0xff]  ;;  %vm222_vm4 = vcmask 162816   ;;  %s258_s22 = sshll.u32 %s448_s7, 4  ;;  %s259_s22 = int_to_ptr.hbm [resolvable:$true] %s258_s22 }
   0xd   :  { %v36_v11 = vld [vmem:[%s442_s1 + $0x28] sm:$0xff]  ;;  %v37_v16 = vld [vmem:[%s442_s1 + $0x30] sm:$0x3]  ;;  %v154_v19 = vld [vmem:[%s445_s4] sm:$0xff] }
   0xe   :  { %72 = vperm.xlu0 %285, %v43_v9   ;;  %v39_v13 = vld [vmem:[%s443_s2 + $0x8] sm:$0xff]  ;;  %v156_v17 = vld [vmem:[%s445_s4 + $0x10] sm:$0xf]  ;;  %v34_v20 = vld [vmem:[%s442_s1 + $0x18] sm:$0xff] }
   0xf   :  { %269 = vmatmul.msk.f32.gmra.mxu0 %vm80_vm1, %v32_v10  ;;  %v155_v18 = vld [vmem:[%s445_s4 + $0x8] sm:$0xff]  ;;  %v215_v21 = vld [vmem:[#allocation2] sm:$0x1]  ;;  %v153_v52 = vld [vmem:[%s444_s3 + $0x10] sm:$0xf] }
  0x10   :  { %273 = vmatmul.msk.f32.gmra.mxu3 %vm80_vm1, %v36_v11  ;;  %62 = vperm.xlu1 %286, %v41_v12   ;;  %v151_v50 = vld [vmem:[%s444_s3] sm:$0xff]  ;;  %v152_v51 = vld [vmem:[%s444_s3 + $0x8] sm:$0xff]  ;;  %s315_s3 = smov [#allocation3]  }
  0x11   :  { %v214_v1 = vld [vmem:[%s446_s5] sm:$0x1]  ;;  %s256_s19 = sshll.u32 %s315_s3, 4  ;;  %s257_s19 = int_to_ptr.vmem [resolvable:$true] %s256_s19 }
  0x12   :  { %52 = vperm.xlu2 %287, %v39_v13  }
  0x16   :  { %47 = vperm.xlu0 %285, %v38_v14  }
  0x17   :  { %270 = vmatmul.msk.f32.gmra.mxu0 %vm80_vm1, %v33_v15 }
  0x18   :  { %274 = vmatmul.msk.f32.gmra.mxu3 %vm80_vm1, %v37_v16  ;;  %169 = vperm.xlu1 %286, %v156_v17  }
  0x1a   :  { %164 = vperm.xlu2 %287, %v155_v18  }
  0x1e   :  { %159 = vperm.xlu0 %285, %v154_v19  }
  0x1f   :  { %271 = vmatmul.msk.f32.gmra.mxu0 %vm80_vm1, %v34_v20 }
  0x20   :  { %218 = vperm.xlu1 %286, %v215_v21  }
  0x64   :  { %v58_v29 = vpop.permute.xlu2 %57 }
  0x6c   :  { %v53_v40 = vpop.permute.xlu2 %52 }
  0x74   :  { %v165_v55 = vpop.permute.xlu2 %164 }
  0x78   :  { %v78_v25 = vpop.permute.xlu0 %77 }
  0x7a   :  { %v68_v28 = vpop.permute.xlu1 %67 }
  0x80   :  { %v73_v30 = vpop.permute.xlu0 %72 }
  0x82   :  { %v63_v37 = vpop.permute.xlu1 %62 }
  0x84   :  { %v123_v22 = vpop.f32.mrf.mxu0 }
  0x88   :  { %v48_v43 = vpop.permute.xlu0 %47 }
  0x89   :  { %v124_v46 = vadd.f32 %v123_v22, %v48_v43 }
  0x8a   :  { %v170_v56 = vpop.permute.xlu1 %169 }
  0x8b   :  { %v135_v23 = vpop.f32.mrf.mxu3  ;;  %v144_v49 = vmax.f32 %v124_v46, 0.0 }
  0x8c   :  { %v126_v24 = vpop.f32.mrf.mxu0  ;;  %v136_v35 = vadd.f32 %v135_v23, %v68_v28 }
  0x8d   :  { %v127_v44 = vadd.f32 %v126_v24, %v53_v40 }
  0x8e   :  { %v148_v41 = vmax.f32 %v136_v35, 0.0 }
  0x8f   :  { %v145_v48 = vmax.f32 %v127_v44, 0.0 }
  0x90   :  { %v160_v60 = vpop.permute.xlu0 %159 }
  0x92   :  { %v219_v2 = vpop.permute.xlu1 %218 }
  0x93   :  { %v138_v26 = vpop.f32.mrf.mxu3  ;;  %v221_v3 = vperm.slane %v219_v2, 0 }
  0x94   :  { %v129_v27 = vpop.f32.mrf.mxu0  ;;  %v139_v32 = vadd.f32 %v138_v26, %v73_v30 }
  0x95   :  { %v130_v42 = vadd.f32 %v129_v27, %v58_v29 }
  0x96   :  { %v149_v38 = vmax.f32 %v139_v32, 0.0 }
  0x97   :  { %v146_v47 = vmax.f32 %v130_v42, 0.0 }
  0x9b   :  { %v141_v31 = vpop.f32.mrf.mxu3 }
  0x9c   :  { %v142_v33 = vadd.f32 %v141_v31, %v78_v25  ;;  %v132_v34 = vpop.f32.mrf.mxu0 }
  0x9d   :  { %v133_v39 = vadd.f32 %v132_v34, %v63_v37 }
  0x9e   :  { %v150_v36 = vmax.f32 %v142_v33, 0.0 }
  0x9f   :  { %v147_v45 = vmax.f32 %v133_v39, 0.0 }
  0xa0   :  { %275 = vmatpush.msk.msra.mxu1 %vm102_vm0, %v150_v36 }
  0xa2   :  { %195 = vmatpush.msra.mxu1 %v149_v38 }
  0xa4   :  { %196 = vmatpush.msra.mxu1 %v148_v41 }
  0xa6   :  { %197 = vmatpush.msra.mxu1 %v147_v45 }
  0xa8   :  { %198 = vmatpush.msra.mxu1 %v146_v47 }
  0xaa   :  { %199 = vmatpush.msra.mxu1 %v145_v48 }
  0xac   :  { %200 = vmatpush.msra.mxu1 %v144_v49 }
  0xad   :  { %276 = vmatmul.msk.f32.vlgmr.msra.gmra.mxu1 %vm172_vm2, %v151_v50 }
  0xb5   :  { %277 = vmatmul.msk.f32.gmra.mxu1 %vm172_vm2, %v152_v51 }
  0xbd   :  { %278 = vmatmul.msk.f32.gmra.mxu1 %vm172_vm2, %v153_v52 }
 0x12a   :  { %v202_v53 = vpop.f32.mrf.mxu1 }
 0x12b   :  { %v203_v61 = vadd.f32 %v202_v53, %v160_v60 }
 0x12d   :  { %v211_v0 = vmax.f32 %v203_v61, 0.0 }
 0x132   :  { %v205_v54 = vpop.f32.mrf.mxu1 }
 0x133   :  { %v206_v58 = vadd.f32 %v205_v54, %v165_v55 }
 0x135   :  { %v212_v63 = vmax.f32 %v206_v58, 0.0 }
 0x13a   :  { %v208_v57 = vpop.f32.mrf.mxu1 }
 0x13b   :  { %v209_v59 = vadd.f32 %v208_v57, %v170_v56 }
 0x13d   :  { %v213_v62 = vmax.f32 %v209_v59, 0.0 }
 0x13f   :  { %279 = vmatpush.msk.msra.mxu2 %vm226_vm3, %v213_v62 }
 0x141   :  { %244 = vmatpush.msra.mxu2 %v212_v63 }
 0x143   :  { %245 = vmatpush.msra.mxu2 %v211_v0 }
 0x144   :  { %280 = vmatmul.msk.f32.vlgmr.msra.gmra.mxu2 %vm222_vm4, %v214_v1 }
 0x1c7   :  { %v247_v4 = vpop.f32.mrf.mxu2 }
 0x1c8   :  { %v248_v5 = vadd.f32 %v247_v4, %v221_v3 }
 0x1ca   :  { %250 = vst [vmem:[#allocation3] sm:$0x1] %v248_v5 }
 0x1cb   :  { %261 = dma.vmem_to_hbm [thread:$0]  %s257_s19, 16, %s259_s22, [#allocation4]  }
 0x1cc   :  { %312 = dma.done.wait [#allocation4], 16  }
 0x1cd   :  { %313 = vsyncadd [#allocation4], 4294967280 }
 0x1ce   :  { %266 = vsyncpa [#allocation4], 1 }

</bundles_post_ra>
